<compile_context>
chip_gen: v7x
topology: tpu7x:2x2x1
jax: 0.10.0
libtpu: 0.0.40
codegen_flags: <defaults>
</compile_context>

<pallas_src>
import functools
import math

import jax
import jax.numpy as jnp
from jax.experimental import pallas as pl
from jax.experimental.pallas import tpu as pltpu


def _int_pow(x, n):
    """x**n for a small static positive int n via repeated squaring (VPU only)."""
    result = None
    base = x
    while n > 0:
        if n & 1:
            result = base if result is None else result * base
        n >>= 1
        if n:
            base = base * base
    return result


def ncod_kernel(logits_ref, labels_ref, conf_ref, emb_ref, avg_ref, cnt_ref,
                out_ref, *, num_classes, temperature, reg_weight, orth_weight,
                k_lo, k_hi, frac):
    B, C = logits_ref.shape
    _, D = emb_ref.shape

    # Row-wise VPU/EUP math in f32; large MXU matmuls keep their native dtype.
    logits = logits_ref[...].astype(jnp.float32)             # [B, C]
    labels = labels_ref[...]                                  # [B, 1] int32
    conf = conf_ref[...].astype(jnp.float32)                  # [B, 1]
    emb_in = emb_ref[...]                                      # [B, D] native dtype
    emb = emb_in.astype(jnp.float32)                           # [B, D] f32
    prev_avg = avg_ref[0]                                      # scalar f32 (SMEM)
    upd_cnt = cnt_ref[0]                                       # scalar int32 (SMEM)

    class_ids = jax.lax.broadcasted_iota(jnp.int32, (B, C), 1)
    onehot = (class_ids == labels).astype(jnp.float32)         # [B, C]

    # ---------------- per-sample cross entropy (single exp pass) ------------
    m = jnp.max(logits, axis=1, keepdims=True)
    z = logits - m                                             # z <= 0, == 0 at argmax
    ez = jnp.exp(z)                                            # reused below
    lse = jnp.log(jnp.sum(ez, axis=1, keepdims=True))
    ce = lse - jnp.sum(z * onehot, axis=1, keepdims=True)      # [B, 1]

    # ---------------- adaptive threshold selection (no probs matrix) --------
    # max softmax prob of (logits/T) == 1 / sum(exp(z/T)); argmax == argmax(z).
    inv_t = 1.0 / temperature
    n_pow = int(round(inv_t))
    if abs(inv_t - n_pow) < 1e-9 and 1 <= n_pow <= 16:
        te = _int_pow(ez, n_pow)                               # VPU only, no 2nd exp
    else:
        te = jnp.exp(z * inv_t)
    pred_probs = 1.0 / jnp.sum(te, axis=1, keepdims=True)      # [B, 1], exact f32
    predicted = jnp.min(jnp.where(z >= 0.0, class_ids, C), axis=1, keepdims=True)
    agreement = (predicted == labels).astype(jnp.float32)      # [B, 1]

    # squared embedding norms (shared by orth + consistency stages)
    sqn = jnp.sum(emb * emb, axis=1, keepdims=True)            # [B, 1] f32

    # [1, B] transposed rows via tiny one-hot selector matmuls (exact; no [B,B]
    # broadcast matrices are ever materialized).
    lane8 = jax.lax.broadcasted_iota(jnp.int32, (B, 8), 1)
    packk = jnp.where(lane8 == 0, pred_probs,
                      jnp.where(lane8 == 1, sqn, 0.0))          # [B, 8]
    lane1x8 = jax.lax.broadcasted_iota(jnp.int32, (1, 8), 1)
    sel_pp = (lane1x8 == 0).astype(jnp.float32)                 # [1, 8]
    sel_sq = (lane1x8 == 1).astype(jnp.float32)                 # [1, 8]
    ppT = jax.lax.dot_general(sel_pp, packk, (((1,), (1,)), ((), ())),
                              preferred_element_type=jnp.float32)   # [1, B]
    sqnT = jax.lax.dot_general(sel_sq, packk, (((1,), (1,)), ((), ())),
                               preferred_element_type=jnp.float32)  # [1, B]

    # torch.quantile(pred_probs, 0.5) via fused rank counting (one [B,B] pass;
    # the j<i iota predicate is local to this stage and dies here).
    tri = (jax.lax.broadcasted_iota(jnp.int32, (B, B), 1)
           < jax.lax.broadcasted_iota(jnp.int32, (B, B), 0))    # j < i
    below = jnp.logical_or(ppT < pred_probs,
                           jnp.logical_and(ppT == pred_probs, tri))
    rank = jnp.sum(below.astype(jnp.float32), axis=1, keepdims=True)   # [B, 1]
    v_lo = jnp.sum(jnp.where(rank == k_lo, pred_probs, 0.0), keepdims=True)
    v_hi = jnp.sum(jnp.where(rank == k_hi, pred_probs, 0.0), keepdims=True)
    threshold_q = v_lo + frac * (v_hi - v_lo)                   # (1, 1)
    clean_mask = jnp.logical_and(pred_probs > threshold_q,
                                 agreement == 1.0).astype(jnp.float32)  # [B, 1]

    # ---------------- sample weights (loss moving average, EMA state) -------
    cur_avg = jnp.mean(ce, keepdims=True)                       # (1, 1)
    is_first = (upd_cnt == 0).astype(jnp.float32)
    new_avg = is_first * cur_avg + (1.0 - is_first) * (0.9 * prev_avg + 0.1 * cur_avg)
    loss_thr = new_avg * 1.5
    clean2 = (ce < loss_thr).astype(jnp.float32)                # [B, 1]
    sample_w = clean2 * conf + (1.0 - clean2) * 0.1             # [B, 1]
    weighted_ce = jnp.mean(ce * sample_w, keepdims=True)        # (1, 1)

    # ---------------- orthogonal regularization (f32 matmul for parity) -----
    emb_n = emb / jnp.maximum(jnp.sqrt(sqn), 1e-12)             # F.normalize
    corr = jax.lax.dot_general(emb_n, emb_n, (((0,), (0,)), ((), ())),
                               preferred_element_type=jnp.float32)      # [D, D]
    di = jax.lax.broadcasted_iota(jnp.int32, (D, D), 0)
    dj = jax.lax.broadcasted_iota(jnp.int32, (D, D), 1)
    diff = corr - (di == dj).astype(jnp.float32)
    orth = jnp.sum(diff * diff, keepdims=True)                  # (1, 1)

    # ---------------- consistency regularization ----------------------------
    gram = jax.lax.dot_general(emb_in, emb_in, (((1,), (1,)), ((), ())),
                               preferred_element_type=jnp.float32)      # [B, B]
    # Fused pairwise distances: ||e_i||^2 + ||e_j||^2 via (B,1)+(1,B) broadcast,
    # diagonal forced to exactly 0 (fresh row==col predicate, built only here).
    rr = jax.lax.broadcasted_iota(jnp.int32, (B, B), 0)
    cc = jax.lax.broadcasted_iota(jnp.int32, (B, B), 1)
    dist = jnp.where(rr == cc, 0.0,
                     jnp.sqrt(jnp.maximum(sqn + sqnT - 2.0 * gram, 0.0)))  # [B, B]

    member = clean_mask * onehot                                # [B, C]
    mm_dtype = emb_in.dtype   # bf16 in bf16 training (cheap MXU); f32 for parity
    dm = jax.lax.dot_general(dist.astype(mm_dtype), member.astype(mm_dtype),
                             (((1,), (0,)), ((), ())),
                             preferred_element_type=jnp.float32)          # [B, C]
    n_c = jnp.sum(member, axis=0, keepdims=True)                # [1, C]
    class_sum = jnp.sum(member * dm, axis=0, keepdims=True)     # [1, C]
    pair_cnt = n_c * (n_c - 1.0)
    safe_cnt = jnp.where(n_c >= 2.0, pair_cnt, 1.0)
    per_class = jnp.where(n_c >= 2.0, class_sum / safe_cnt, 0.0)
    cons = jnp.sum(per_class, keepdims=True) / float(num_classes)         # (1, 1)
    n_clean = jnp.sum(clean_mask, keepdims=True)
    cons = jnp.where(n_clean >= 2.0, cons, 0.0)

    total = weighted_ce + reg_weight * cons + orth_weight * orth

    # ---------------- one packed lane-contiguous scalar write ---------------
    lane_out = jax.lax.broadcasted_iota(jnp.int32, (1, 8), 1)
    packed = (jnp.where(lane_out == 0, total, 0.0)
              + jnp.where(lane_out == 1, cur_avg, 0.0)
              + jnp.where(lane_out == 2, weighted_ce, 0.0)
              + jnp.where(lane_out == 3, cons, 0.0)
              + jnp.where(lane_out == 4, orth, 0.0)
              + jnp.where(lane_out == 5, jnp.mean(clean_mask, keepdims=True), 0.0)
              + jnp.where(lane_out == 6, jnp.mean(sample_w, keepdims=True), 0.0)
              + jnp.where(lane_out == 7, new_avg, 0.0))
    out_ref[...] = packed


def ncod_loss(logits, labels, confidence, embeddings, loss_moving_avg,
              update_count, *, num_classes, lambda_reg=0.1, lambda_orth=0.01,
              temperature=0.5, warmup_epochs=10, current_epoch=0):
    B, C = logits.shape
    _, D = embeddings.shape

    if current_epoch < warmup_epochs:
        wf = current_epoch / warmup_epochs
        reg_weight = lambda_reg * wf
        orth_weight = lambda_orth * wf
    else:
        reg_weight, orth_weight = lambda_reg, lambda_orth

    # torch.quantile(., 0.5) linear-interpolation constants
    pos = 0.5 * (B - 1)
    k_lo = math.floor(pos)
    k_hi = math.ceil(pos)
    frac = pos - k_lo

    kernel = functools.partial(
        ncod_kernel,
        num_classes=num_classes,
        temperature=float(temperature),
        reg_weight=float(reg_weight),
        orth_weight=float(orth_weight),
        k_lo=float(k_lo),
        k_hi=float(k_hi),
        frac=float(frac),
    )

    # Generation-aware VMEM hint: sized from actual temporaries, capped at ~80%
    # of this chip's VMEM (v5e/v6e 128 MiB, v7x 64 MiB per TensorCore).
    est = 4 * (4 * B * B + 3 * B * D + 6 * B * C + 2 * D * D + 64 * B) + (2 << 20)
    try:
        vmem_cap = int(pltpu.get_tpu_info().vmem_capacity_bytes)
    except Exception:
        vmem_cap = 128 << 20
    vmem_limit = int(min(int(0.8 * vmem_cap), max(32 << 20, 2 * est)))

    vmem = pltpu.MemorySpace.VMEM
    smem = pltpu.MemorySpace.SMEM

    out = pl.pallas_call(
        kernel,
        out_shape=jax.ShapeDtypeStruct((1, 8), jnp.float32),
        in_specs=[
            pl.BlockSpec(memory_space=vmem),   # logits (native dtype)
            pl.BlockSpec(memory_space=vmem),   # labels [B, 1] int32
            pl.BlockSpec(memory_space=vmem),   # confidence [B, 1]
            pl.BlockSpec(memory_space=vmem),   # graph embeddings (native dtype)
            pl.BlockSpec(memory_space=smem),   # loss_moving_avg (1,) f32
            pl.BlockSpec(memory_space=smem),   # update_count    (1,) int32
        ],
        out_specs=pl.BlockSpec(memory_space=vmem),
        compiler_params=pltpu.CompilerParams(vmem_limit_bytes=vmem_limit),
    )(
        logits,                                       # no wrapper up-cast
        labels.reshape(B, 1).astype(jnp.int32),
        confidence.reshape(B, 1),
        embeddings,                                   # no wrapper up-cast
        loss_moving_avg.reshape(1).astype(jnp.float32),
        update_count.reshape(1).astype(jnp.int32),
    )

    total = out[0, 0]
    loss_dict = {
        "total_loss": total,
        "ce_loss": out[0, 1],
        "weighted_ce_loss": out[0, 2],
        "consistency_loss": out[0, 3],
        "orthogonal_loss": out[0, 4],
        "clean_ratio": out[0, 5],
        "avg_sample_weight": out[0, 6],
    }
    new_loss_moving_avg = out[0, 7:8]
    # int32 counter is bumped outside the kernel (no f32 precision loss).
    new_update_count = update_count.reshape(1).astype(jnp.int32) + 1
    return total, loss_dict, (new_loss_moving_avg, new_update_count)


if __name__ == "__main__":
    B, C, D = 8, 4, 32  # batch, num_classes, graph-embedding dim

    key = jax.random.PRNGKey(0)
    k1, k2, k3, k4 = jax.random.split(key, 4)
    logits = jax.random.normal(k1, (B, C), jnp.float32)
    labels = jax.random.randint(k2, (B,), 0, C, jnp.int32)
    confidence = jax.nn.sigmoid(jax.random.normal(k3, (B, 1), jnp.float32))
    embeddings = jax.random.normal(k4, (B, D), jnp.float32)

    # register_buffer state: loss_moving_avg (f32) and update_count (int32)
    loss_moving_avg = jnp.zeros((1,), jnp.float32)
    update_count = jnp.zeros((1,), jnp.int32)

    total, loss_dict, new_state = ncod_loss(
        logits, labels, confidence, embeddings, loss_moving_avg, update_count,
        num_classes=C, lambda_reg=0.1, lambda_orth=0.01,
        temperature=0.5, warmup_epochs=10, current_epoch=5,  # set_epoch(5)
    )
    jax.block_until_ready((total, loss_dict, new_state))
    print("KERNEL_OK")
</pallas_src>

<mosaic_0001>
module attributes {stable_mosaic.version = 11 : i64} {
  func.func @ncod_kernel(%arg0: memref<8x4xf32, #tpu.memory_space<vmem>>, %arg1: memref<8x1xi32, #tpu.memory_space<vmem>>, %arg2: memref<8x1xf32, #tpu.memory_space<vmem>>, %arg3: memref<8x32xf32, #tpu.memory_space<vmem>>, %arg4: memref<1xf32, #tpu.memory_space<smem>>, %arg5: memref<1xi32, #tpu.memory_space<smem>>, %arg6: memref<1x8xf32, #tpu.memory_space<vmem>>) attributes {dimension_semantics = [], scalar_prefetch = 0 : i64, scratch_operands = 0 : i64, tpu.core_type = #tpu.core_type<tc>} {
    %c0 = arith.constant 0 : index
    %c0_0 = arith.constant 0 : index
    %0 = vector.load %arg0[%c0, %c0_0] : memref<8x4xf32, #tpu.memory_space<vmem>>, vector<8x4xf32>
    %c0_1 = arith.constant 0 : index
    %c0_2 = arith.constant 0 : index
    %1 = vector.load %arg1[%c0_1, %c0_2] : memref<8x1xi32, #tpu.memory_space<vmem>>, vector<8x1xi32>
    %c0_3 = arith.constant 0 : index
    %c0_4 = arith.constant 0 : index
    %2 = vector.load %arg2[%c0_3, %c0_4] : memref<8x1xf32, #tpu.memory_space<vmem>>, vector<8x1xf32>
    %c0_5 = arith.constant 0 : index
    %c0_6 = arith.constant 0 : index
    %3 = vector.load %arg3[%c0_5, %c0_6] : memref<8x32xf32, #tpu.memory_space<vmem>>, vector<8x32xf32>
    %c0_7 = arith.constant 0 : index
    %4 = memref.load %arg4[%c0_7] : memref<1xf32, #tpu.memory_space<smem>>
    %c0_8 = arith.constant 0 : index
    %5 = memref.load %arg5[%c0_8] : memref<1xi32, #tpu.memory_space<smem>>
    %6 = tpu.iota {dimensions = array<i32: 1>} : vector<8x4xi32>
    %7 = vector.broadcast %1 : vector<8x1xi32> to vector<8x4xi32>
    %8 = arith.cmpi eq, %6, %7 : vector<8x4xi32>
    %9 = arith.extui %8 : vector<8x4xi1> to vector<8x4xi32>
    %10 = arith.sitofp %9 : vector<8x4xi32> to vector<8x4xf32>
    %cst = arith.constant dense<0xFF800000> : vector<8xf32>
    %11 = vector.multi_reduction <maximumf>, %0, %cst [1] : vector<8x4xf32> to vector<8xf32>
    %12 = vector.shape_cast %11 : vector<8xf32> to vector<8x1xf32>
    %13 = vector.broadcast %12 : vector<8x1xf32> to vector<8x4xf32>
    %14 = arith.subf %0, %13 : vector<8x4xf32>
    %15 = math.exp %14 : vector<8x4xf32>
    %cst_9 = arith.constant dense<0.000000e+00> : vector<8xf32>
    %16 = vector.multi_reduction <add>, %15, %cst_9 [1] : vector<8x4xf32> to vector<8xf32>
    %17 = vector.shape_cast %16 : vector<8xf32> to vector<8x1xf32>
    %18 = math.log %17 : vector<8x1xf32>
    %19 = arith.mulf %14, %10 : vector<8x4xf32>
    %cst_10 = arith.constant dense<0.000000e+00> : vector<8xf32>
    %20 = vector.multi_reduction <add>, %19, %cst_10 [1] : vector<8x4xf32> to vector<8xf32>
    %21 = vector.shape_cast %20 : vector<8xf32> to vector<8x1xf32>
    %22 = arith.subf %18, %21 : vector<8x1xf32>
    %23 = arith.mulf %15, %15 : vector<8x4xf32>
    %cst_11 = arith.constant dense<0.000000e+00> : vector<8xf32>
    %24 = vector.multi_reduction <add>, %23, %cst_11 [1] : vector<8x4xf32> to vector<8xf32>
    %25 = vector.shape_cast %24 : vector<8xf32> to vector<8x1xf32>
    %cst_12 = arith.constant 1.000000e+00 : f32
    %26 = vector.broadcast %cst_12 : f32 to vector<8x1xf32>
    %27 = arith.divf %26, %25 : vector<8x1xf32>
    %cst_13 = arith.constant 0.000000e+00 : f32
    %28 = vector.broadcast %cst_13 : f32 to vector<8x4xf32>
    %29 = arith.cmpf oge, %14, %28 : vector<8x4xf32>
    %c4_i32 = arith.constant 4 : i32
    %30 = vector.broadcast %c4_i32 : i32 to vector<8x4xi32>
    %31 = arith.select %29, %6, %30 : vector<8x4xi1>, vector<8x4xi32>
    %cst_14 = arith.constant dense<2147483647> : vector<8xi32>
    %32 = vector.multi_reduction <minsi>, %31, %cst_14 [1] : vector<8x4xi32> to vector<8xi32>
    %33 = vector.shape_cast %32 : vector<8xi32> to vector<8x1xi32>
    %34 = arith.cmpi eq, %33, %1 : vector<8x1xi32>
    %35 = arith.extui %34 : vector<8x1xi1> to vector<8x1xi32>
    %36 = arith.sitofp %35 : vector<8x1xi32> to vector<8x1xf32>
    %37 = arith.mulf %3, %3 : vector<8x32xf32>
    %cst_15 = arith.constant dense<0.000000e+00> : vector<8xf32>
    %38 = vector.multi_reduction <add>, %37, %cst_15 [1] : vector<8x32xf32> to vector<8xf32>
    %39 = vector.shape_cast %38 : vector<8xf32> to vector<8x1xf32>
    %40 = tpu.iota {dimensions = array<i32: 1>} : vector<8x8xi32>
    %c0_i32 = arith.constant 0 : i32
    %41 = vector.broadcast %c0_i32 : i32 to vector<8x8xi32>
    %42 = arith.cmpi eq, %40, %41 : vector<8x8xi32>
    %c1_i32 = arith.constant 1 : i32
    %43 = vector.broadcast %c1_i32 : i32 to vector<8x8xi32>
    %44 = arith.cmpi eq, %40, %43 : vector<8x8xi32>
    %cst_16 = arith.constant 0.000000e+00 : f32
    %45 = vector.shape_cast %39 : vector<8x1xf32> to vector<8x1xf32>
    %46 = vector.broadcast %45 : vector<8x1xf32> to vector<8x8xf32>
    %47 = vector.broadcast %cst_16 : f32 to vector<8x8xf32>
    %48 = arith.select %44, %46, %47 : vector<8x8xi1>, vector<8x8xf32>
    %49 = vector.shape_cast %27 : vector<8x1xf32> to vector<8x1xf32>
    %50 = vector.broadcast %49 : vector<8x1xf32> to vector<8x8xf32>
    %51 = arith.select %42, %50, %48 : vector<8x8xi1>, vector<8x8xf32>
    %52 = tpu.iota {dimensions = array<i32: 1>} : vector<1x8xi32>
    %c0_i32_17 = arith.constant 0 : i32
    %53 = vector.broadcast %c0_i32_17 : i32 to vector<1x8xi32>
    %54 = arith.cmpi eq, %52, %53 : vector<1x8xi32>
    %55 = arith.extui %54 : vector<1x8xi1> to vector<1x8xi32>
    %56 = arith.sitofp %55 : vector<1x8xi32> to vector<1x8xf32>
    %c1_i32_18 = arith.constant 1 : i32
    %57 = vector.broadcast %c1_i32_18 : i32 to vector<1x8xi32>
    %58 = arith.cmpi eq, %52, %57 : vector<1x8xi32>
    %59 = arith.extui %58 : vector<1x8xi1> to vector<1x8xi32>
    %60 = arith.sitofp %59 : vector<1x8xi32> to vector<1x8xf32>
    %cst_19 = arith.constant dense<0.000000e+00> : vector<1x8xf32>
    %61 = tpu.matmul %56, %51, %cst_19 {dimension_numbers = #tpu.dot_dimension_numbers<[1], [1], [0], [0], [0, 0, 1, 0], [], []>} : vector<1x8xf32>, vector<8x8xf32>, vector<1x8xf32> -> vector<1x8xf32>
    %cst_20 = arith.constant dense<0.000000e+00> : vector<1x8xf32>
    %62 = tpu.matmul %60, %51, %cst_20 {dimension_numbers = #tpu.dot_dimension_numbers<[1], [1], [0], [0], [0, 0, 1, 0], [], []>} : vector<1x8xf32>, vector<8x8xf32>, vector<1x8xf32> -> vector<1x8xf32>
    %63 = tpu.iota {dimensions = array<i32: 1>} : vector<8x8xi32>
    %64 = tpu.iota {dimensions = array<i32: 0>} : vector<8x8xi32>
    %65 = arith.cmpi slt, %63, %64 : vector<8x8xi32>
    %66 = vector.broadcast %61 : vector<1x8xf32> to vector<8x8xf32>
    %67 = vector.broadcast %27 : vector<8x1xf32> to vector<8x8xf32>
    %68 = arith.cmpf olt, %66, %67 : vector<8x8xf32>
    %69 = vector.broadcast %61 : vector<1x8xf32> to vector<8x8xf32>
    %70 = vector.broadcast %27 : vector<8x1xf32> to vector<8x8xf32>
    %71 = arith.cmpf oeq, %69, %70 : vector<8x8xf32>
    %72 = arith.andi %71, %65 : vector<8x8xi1>
    %73 = arith.ori %68, %72 : vector<8x8xi1>
    %74 = arith.extui %73 : vector<8x8xi1> to vector<8x8xi32>
    %75 = arith.sitofp %74 : vector<8x8xi32> to vector<8x8xf32>
    %cst_21 = arith.constant dense<0.000000e+00> : vector<8xf32>
    %76 = vector.multi_reduction <add>, %75, %cst_21 [1] : vector<8x8xf32> to vector<8xf32>
    %77 = vector.shape_cast %76 : vector<8xf32> to vector<8x1xf32>
    %cst_22 = arith.constant 3.000000e+00 : f32
    %78 = vector.broadcast %cst_22 : f32 to vector<8x1xf32>
    %79 = arith.cmpf oeq, %77, %78 : vector<8x1xf32>
    %cst_23 = arith.constant 0.000000e+00 : f32
    %80 = vector.broadcast %cst_23 : f32 to vector<8x1xf32>
    %81 = arith.select %79, %27, %80 : vector<8x1xi1>, vector<8x1xf32>
    %82 = vector.shape_cast %81 : vector<8x1xf32> to vector<1x8x1xf32>
    %cst_24 = arith.constant dense<0.000000e+00> : vector<1xf32>
    %83 = vector.multi_reduction <add>, %82, %cst_24 [1, 2] : vector<1x8x1xf32> to vector<1xf32>
    %84 = vector.shape_cast %83 : vector<1xf32> to vector<1x1x1xf32>
    %85 = vector.extract %84[0, 0, 0] : f32 from vector<1x1x1xf32>
    %86 = vector.broadcast %85 : f32 to vector<1x1xf32>
    %cst_25 = arith.constant 4.000000e+00 : f32
    %87 = vector.broadcast %cst_25 : f32 to vector<8x1xf32>
    %88 = arith.cmpf oeq, %77, %87 : vector<8x1xf32>
    %cst_26 = arith.constant 0.000000e+00 : f32
    %89 = vector.broadcast %cst_26 : f32 to vector<8x1xf32>
    %90 = arith.select %88, %27, %89 : vector<8x1xi1>, vector<8x1xf32>
    %91 = vector.shape_cast %90 : vector<8x1xf32> to vector<1x8x1xf32>
    %cst_27 = arith.constant dense<0.000000e+00> : vector<1xf32>
    %92 = vector.multi_reduction <add>, %91, %cst_27 [1, 2] : vector<1x8x1xf32> to vector<1xf32>
    %93 = vector.shape_cast %92 : vector<1xf32> to vector<1x1x1xf32>
    %94 = vector.extract %93[0, 0, 0] : f32 from vector<1x1x1xf32>
    %95 = vector.broadcast %94 : f32 to vector<1x1xf32>
    %96 = arith.subf %95, %86 : vector<1x1xf32>
    %cst_28 = arith.constant 5.000000e-01 : f32
    %97 = vector.broadcast %cst_28 : f32 to vector<1x1xf32>
    %98 = arith.mulf %97, %96 : vector<1x1xf32>
    %99 = arith.addf %86, %98 : vector<1x1xf32>
    %100 = vector.broadcast %99 : vector<1x1xf32> to vector<8x1xf32>
    %101 = arith.cmpf ogt, %27, %100 : vector<8x1xf32>
    %cst_29 = arith.constant 1.000000e+00 : f32
    %102 = vector.broadcast %cst_29 : f32 to vector<8x1xf32>
    %103 = arith.cmpf oeq, %36, %102 : vector<8x1xf32>
    %104 = arith.andi %101, %103 : vector<8x1xi1>
    %105 = arith.extui %104 : vector<8x1xi1> to vector<8x1xi32>
    %106 = arith.sitofp %105 : vector<8x1xi32> to vector<8x1xf32>
    %107 = vector.shape_cast %22 : vector<8x1xf32> to vector<1x8x1xf32>
    %cst_30 = arith.constant dense<0.000000e+00> : vector<1xf32>
    %108 = vector.multi_reduction <add>, %107, %cst_30 [1, 2] : vector<1x8x1xf32> to vector<1xf32>
    %109 = vector.shape_cast %108 : vector<1xf32> to vector<1x1x1xf32>
    %110 = vector.extract %109[0, 0, 0] : f32 from vector<1x1x1xf32>
    %111 = vector.broadcast %110 : f32 to vector<1x1xf32>
    %cst_31 = arith.constant 8.000000e+00 : f32
    %112 = vector.broadcast %cst_31 : f32 to vector<1x1xf32>
    %113 = arith.divf %111, %112 : vector<1x1xf32>
    %c0_i32_32 = arith.constant 0 : i32
    %114 = arith.cmpi eq, %5, %c0_i32_32 : i32
    %115 = arith.extui %114 : i1 to i32
    %116 = arith.sitofp %115 : i32 to f32
    %117 = vector.broadcast %116 : f32 to vector<1x1xf32>
    %118 = arith.mulf %117, %113 : vector<1x1xf32>
    %cst_33 = arith.constant 1.000000e+00 : f32
    %119 = arith.subf %cst_33, %116 : f32
    %cst_34 = arith.constant 0.899999976 : f32
    %120 = arith.mulf %cst_34, %4 : f32
    %cst_35 = arith.constant 1.000000e-01 : f32
    %121 = vector.broadcast %cst_35 : f32 to vector<1x1xf32>
    %122 = arith.mulf %121, %113 : vector<1x1xf32>
    %123 = vector.broadcast %120 : f32 to vector<1x1xf32>
    %124 = arith.addf %123, %122 : vector<1x1xf32>
    %125 = vector.broadcast %119 : f32 to vector<1x1xf32>
    %126 = arith.mulf %125, %124 : vector<1x1xf32>
    %127 = arith.addf %118, %126 : vector<1x1xf32>
    %cst_36 = arith.constant 1.500000e+00 : f32
    %128 = vector.broadcast %cst_36 : f32 to vector<1x1xf32>
    %129 = arith.mulf %127, %128 : vector<1x1xf32>
    %130 = vector.broadcast %129 : vector<1x1xf32> to vector<8x1xf32>
    %131 = arith.cmpf olt, %22, %130 : vector<8x1xf32>
    %132 = arith.extui %131 : vector<8x1xi1> to vector<8x1xi32>
    %133 = arith.sitofp %132 : vector<8x1xi32> to vector<8x1xf32>
    %134 = arith.mulf %133, %2 : vector<8x1xf32>
    %cst_37 = arith.constant 1.000000e+00 : f32
    %135 = vector.broadcast %cst_37 : f32 to vector<8x1xf32>
    %136 = arith.subf %135, %133 : vector<8x1xf32>
    %cst_38 = arith.constant 1.000000e-01 : f32
    %137 = vector.broadcast %cst_38 : f32 to vector<8x1xf32>
    %138 = arith.mulf %136, %137 : vector<8x1xf32>
    %139 = arith.addf %134, %138 : vector<8x1xf32>
    %140 = arith.mulf %22, %139 : vector<8x1xf32>
    %141 = vector.shape_cast %140 : vector<8x1xf32> to vector<1x8x1xf32>
    %cst_39 = arith.constant dense<0.000000e+00> : vector<1xf32>
    %142 = vector.multi_reduction <add>, %141, %cst_39 [1, 2] : vector<1x8x1xf32> to vector<1xf32>
    %143 = vector.shape_cast %142 : vector<1xf32> to vector<1x1x1xf32>
    %144 = vector.extract %143[0, 0, 0] : f32 from vector<1x1x1xf32>
    %145 = vector.broadcast %144 : f32 to vector<1x1xf32>
    %cst_40 = arith.constant 8.000000e+00 : f32
    %146 = vector.broadcast %cst_40 : f32 to vector<1x1xf32>
    %147 = arith.divf %145, %146 : vector<1x1xf32>
    %148 = math.sqrt %39 : vector<8x1xf32>
    %cst_41 = arith.constant 9.99999996E-13 : f32
    %149 = vector.broadcast %cst_41 : f32 to vector<8x1xf32>
    %150 = arith.maximumf %148, %149 : vector<8x1xf32>
    %151 = vector.broadcast %150 : vector<8x1xf32> to vector<8x32xf32>
    %152 = arith.divf %3, %151 : vector<8x32xf32>
    %cst_42 = arith.constant dense<0.000000e+00> : vector<32x32xf32>
    %153 = tpu.matmul %152, %152, %cst_42 {dimension_numbers = #tpu.dot_dimension_numbers<[0], [0], [1], [1], [0, 1, 1, 1], [], []>} : vector<8x32xf32>, vector<8x32xf32>, vector<32x32xf32> -> vector<32x32xf32>
    %154 = tpu.iota {dimensions = array<i32: 0>} : vector<32x32xi32>
    %155 = tpu.iota {dimensions = array<i32: 1>} : vector<32x32xi32>
    %156 = arith.cmpi eq, %154, %155 : vector<32x32xi32>
    %157 = arith.extui %156 : vector<32x32xi1> to vector<32x32xi32>
    %158 = arith.sitofp %157 : vector<32x32xi32> to vector<32x32xf32>
    %159 = arith.subf %153, %158 : vector<32x32xf32>
    %160 = arith.mulf %159, %159 : vector<32x32xf32>
    %161 = vector.shape_cast %160 : vector<32x32xf32> to vector<1x32x32xf32>
    %cst_43 = arith.constant dense<0.000000e+00> : vector<1xf32>
    %162 = vector.multi_reduction <add>, %161, %cst_43 [1, 2] : vector<1x32x32xf32> to vector<1xf32>
    %163 = vector.shape_cast %162 : vector<1xf32> to vector<1x1x1xf32>
    %164 = vector.extract %163[0, 0, 0] : f32 from vector<1x1x1xf32>
    %165 = vector.broadcast %164 : f32 to vector<1x1xf32>
    %cst_44 = arith.constant dense<0.000000e+00> : vector<8x8xf32>
    %166 = tpu.matmul %3, %3, %cst_44 {dimension_numbers = #tpu.dot_dimension_numbers<[1], [1], [0], [0], [0, 0, 1, 0], [], []>} : vector<8x32xf32>, vector<8x32xf32>, vector<8x8xf32> -> vector<8x8xf32>
    %167 = tpu.iota {dimensions = array<i32: 0>} : vector<8x8xi32>
    %168 = tpu.iota {dimensions = array<i32: 1>} : vector<8x8xi32>
    %169 = arith.cmpi eq, %167, %168 : vector<8x8xi32>
    %170 = vector.broadcast %39 : vector<8x1xf32> to vector<8x8xf32>
    %171 = vector.broadcast %62 : vector<1x8xf32> to vector<8x8xf32>
    %172 = arith.addf %170, %171 : vector<8x8xf32>
    %cst_45 = arith.constant 2.000000e+00 : f32
    %173 = vector.broadcast %cst_45 : f32 to vector<8x8xf32>
    %174 = arith.mulf %173, %166 : vector<8x8xf32>
    %175 = arith.subf %172, %174 : vector<8x8xf32>
    %cst_46 = arith.constant 0.000000e+00 : f32
    %176 = vector.broadcast %cst_46 : f32 to vector<8x8xf32>
    %177 = arith.maximumf %175, %176 : vector<8x8xf32>
    %178 = math.sqrt %177 : vector<8x8xf32>
    %cst_47 = arith.constant 0.000000e+00 : f32
    %179 = vector.broadcast %cst_47 : f32 to vector<8x8xf32>
    %180 = arith.select %169, %179, %178 : vector<8x8xi1>, vector<8x8xf32>
    %181 = vector.broadcast %106 : vector<8x1xf32> to vector<8x4xf32>
    %182 = arith.mulf %181, %10 : vector<8x4xf32>
    %cst_48 = arith.constant dense<0.000000e+00> : vector<8x4xf32>
    %183 = tpu.matmul %180, %182, %cst_48 {dimension_numbers = #tpu.dot_dimension_numbers<[1], [0], [0], [1], [0, 0, 1, 1], [], []>} : vector<8x8xf32>, vector<8x4xf32>, vector<8x4xf32> -> vector<8x4xf32>
    %cst_49 = arith.constant dense<0.000000e+00> : vector<4xf32>
    %184 = vector.multi_reduction <add>, %182, %cst_49 [0] : vector<8x4xf32> to vector<4xf32>
    %185 = vector.shape_cast %184 : vector<4xf32> to vector<1x4xf32>
    %186 = arith.mulf %182, %183 : vector<8x4xf32>
    %cst_50 = arith.constant dense<0.000000e+00> : vector<4xf32>
    %187 = vector.multi_reduction <add>, %186, %cst_50 [0] : vector<8x4xf32> to vector<4xf32>
    %188 = vector.shape_cast %187 : vector<4xf32> to vector<1x4xf32>
    %cst_51 = arith.constant 1.000000e+00 : f32
    %189 = vector.broadcast %cst_51 : f32 to vector<1x4xf32>
    %190 = arith.subf %185, %189 : vector<1x4xf32>
    %191 = arith.mulf %185, %190 : vector<1x4xf32>
    %cst_52 = arith.constant 2.000000e+00 : f32
    %192 = vector.broadcast %cst_52 : f32 to vector<1x4xf32>
    %193 = arith.cmpf oge, %185, %192 : vector<1x4xf32>
    %cst_53 = arith.constant 1.000000e+00 : f32
    %194 = vector.broadcast %cst_53 : f32 to vector<1x4xf32>
    %195 = arith.select %193, %191, %194 : vector<1x4xi1>, vector<1x4xf32>
    %cst_54 = arith.constant 2.000000e+00 : f32
    %196 = vector.broadcast %cst_54 : f32 to vector<1x4xf32>
    %197 = arith.cmpf oge, %185, %196 : vector<1x4xf32>
    %198 = arith.divf %188, %195 : vector<1x4xf32>
    %cst_55 = arith.constant 0.000000e+00 : f32
    %199 = vector.broadcast %cst_55 : f32 to vector<1x4xf32>
    %200 = arith.select %197, %198, %199 : vector<1x4xi1>, vector<1x4xf32>
    %201 = vector.shape_cast %200 : vector<1x4xf32> to vector<1x1x4xf32>
    %cst_56 = arith.constant dense<0.000000e+00> : vector<1xf32>
    %202 = vector.multi_reduction <add>, %201, %cst_56 [1, 2] : vector<1x1x4xf32> to vector<1xf32>
    %203 = vector.shape_cast %202 : vector<1xf32> to vector<1x1x1xf32>
    %204 = vector.extract %203[0, 0, 0] : f32 from vector<1x1x1xf32>
    %205 = vector.broadcast %204 : f32 to vector<1x1xf32>
    %cst_57 = arith.constant 4.000000e+00 : f32
    %206 = vector.broadcast %cst_57 : f32 to vector<1x1xf32>
    %207 = arith.divf %205, %206 : vector<1x1xf32>
    %208 = vector.shape_cast %106 : vector<8x1xf32> to vector<1x8x1xf32>
    %cst_58 = arith.constant dense<0.000000e+00> : vector<1xf32>
    %209 = vector.multi_reduction <add>, %208, %cst_58 [1, 2] : vector<1x8x1xf32> to vector<1xf32>
    %210 = vector.shape_cast %209 : vector<1xf32> to vector<1x1x1xf32>
    %211 = vector.extract %210[0, 0, 0] : f32 from vector<1x1x1xf32>
    %212 = vector.broadcast %211 : f32 to vector<1x1xf32>
    %cst_59 = arith.constant 2.000000e+00 : f32
    %213 = vector.broadcast %cst_59 : f32 to vector<1x1xf32>
    %214 = arith.cmpf oge, %212, %213 : vector<1x1xf32>
    %cst_60 = arith.constant 0.000000e+00 : f32
    %215 = vector.broadcast %cst_60 : f32 to vector<1x1xf32>
    %216 = arith.select %214, %207, %215 : vector<1x1xi1>, vector<1x1xf32>
    %cst_61 = arith.constant 5.000000e-02 : f32
    %217 = vector.broadcast %cst_61 : f32 to vector<1x1xf32>
    %218 = arith.mulf %217, %216 : vector<1x1xf32>
    %219 = arith.addf %147, %218 : vector<1x1xf32>
    %cst_62 = arith.constant 5.000000e-03 : f32
    %220 = vector.broadcast %cst_62 : f32 to vector<1x1xf32>
    %221 = arith.mulf %220, %165 : vector<1x1xf32>
    %222 = arith.addf %219, %221 : vector<1x1xf32>
    %223 = tpu.iota {dimensions = array<i32: 1>} : vector<1x8xi32>
    %c0_i32_63 = arith.constant 0 : i32
    %224 = vector.broadcast %c0_i32_63 : i32 to vector<1x8xi32>
    %225 = arith.cmpi eq, %223, %224 : vector<1x8xi32>
    %cst_64 = arith.constant 0.000000e+00 : f32
    %226 = vector.shape_cast %222 : vector<1x1xf32> to vector<1x1xf32>
    %227 = vector.broadcast %226 : vector<1x1xf32> to vector<1x8xf32>
    %228 = vector.broadcast %cst_64 : f32 to vector<1x8xf32>
    %229 = arith.select %225, %227, %228 : vector<1x8xi1>, vector<1x8xf32>
    %c1_i32_65 = arith.constant 1 : i32
    %230 = vector.broadcast %c1_i32_65 : i32 to vector<1x8xi32>
    %231 = arith.cmpi eq, %223, %230 : vector<1x8xi32>
    %cst_66 = arith.constant 0.000000e+00 : f32
    %232 = vector.shape_cast %113 : vector<1x1xf32> to vector<1x1xf32>
    %233 = vector.broadcast %232 : vector<1x1xf32> to vector<1x8xf32>
    %234 = vector.broadcast %cst_66 : f32 to vector<1x8xf32>
    %235 = arith.select %231, %233, %234 : vector<1x8xi1>, vector<1x8xf32>
    %236 = arith.addf %229, %235 : vector<1x8xf32>
    %c2_i32 = arith.constant 2 : i32
    %237 = vector.broadcast %c2_i32 : i32 to vector<1x8xi32>
    %238 = arith.cmpi eq, %223, %237 : vector<1x8xi32>
    %cst_67 = arith.constant 0.000000e+00 : f32
    %239 = vector.shape_cast %147 : vector<1x1xf32> to vector<1x1xf32>
    %240 = vector.broadcast %239 : vector<1x1xf32> to vector<1x8xf32>
    %241 = vector.broadcast %cst_67 : f32 to vector<1x8xf32>
    %242 = arith.select %238, %240, %241 : vector<1x8xi1>, vector<1x8xf32>
    %243 = arith.addf %236, %242 : vector<1x8xf32>
    %c3_i32 = arith.constant 3 : i32
    %244 = vector.broadcast %c3_i32 : i32 to vector<1x8xi32>
    %245 = arith.cmpi eq, %223, %244 : vector<1x8xi32>
    %cst_68 = arith.constant 0.000000e+00 : f32
    %246 = vector.shape_cast %216 : vector<1x1xf32> to vector<1x1xf32>
    %247 = vector.broadcast %246 : vector<1x1xf32> to vector<1x8xf32>
    %248 = vector.broadcast %cst_68 : f32 to vector<1x8xf32>
    %249 = arith.select %245, %247, %248 : vector<1x8xi1>, vector<1x8xf32>
    %250 = arith.addf %243, %249 : vector<1x8xf32>
    %c4_i32_69 = arith.constant 4 : i32
    %251 = vector.broadcast %c4_i32_69 : i32 to vector<1x8xi32>
    %252 = arith.cmpi eq, %223, %251 : vector<1x8xi32>
    %cst_70 = arith.constant 0.000000e+00 : f32
    %253 = vector.shape_cast %165 : vector<1x1xf32> to vector<1x1xf32>
    %254 = vector.broadcast %253 : vector<1x1xf32> to vector<1x8xf32>
    %255 = vector.broadcast %cst_70 : f32 to vector<1x8xf32>
    %256 = arith.select %252, %254, %255 : vector<1x8xi1>, vector<1x8xf32>
    %257 = arith.addf %250, %256 : vector<1x8xf32>
    %c5_i32 = arith.constant 5 : i32
    %258 = vector.broadcast %c5_i32 : i32 to vector<1x8xi32>
    %259 = arith.cmpi eq, %223, %258 : vector<1x8xi32>
    %260 = vector.shape_cast %106 : vector<8x1xf32> to vector<1x8x1xf32>
    %cst_71 = arith.constant dense<0.000000e+00> : vector<1xf32>
    %261 = vector.multi_reduction <add>, %260, %cst_71 [1, 2] : vector<1x8x1xf32> to vector<1xf32>
    %262 = vector.shape_cast %261 : vector<1xf32> to vector<1x1x1xf32>
    %263 = vector.extract %262[0, 0, 0] : f32 from vector<1x1x1xf32>
    %264 = vector.broadcast %263 : f32 to vector<1x1xf32>
    %cst_72 = arith.constant 8.000000e+00 : f32
    %265 = vector.broadcast %cst_72 : f32 to vector<1x1xf32>
    %266 = arith.divf %264, %265 : vector<1x1xf32>
    %cst_73 = arith.constant 0.000000e+00 : f32
    %267 = vector.shape_cast %266 : vector<1x1xf32> to vector<1x1xf32>
    %268 = vector.broadcast %267 : vector<1x1xf32> to vector<1x8xf32>
    %269 = vector.broadcast %cst_73 : f32 to vector<1x8xf32>
    %270 = arith.select %259, %268, %269 : vector<1x8xi1>, vector<1x8xf32>
    %271 = arith.addf %257, %270 : vector<1x8xf32>
    %c6_i32 = arith.constant 6 : i32
    %272 = vector.broadcast %c6_i32 : i32 to vector<1x8xi32>
    %273 = arith.cmpi eq, %223, %272 : vector<1x8xi32>
    %274 = vector.shape_cast %139 : vector<8x1xf32> to vector<1x8x1xf32>
    %cst_74 = arith.constant dense<0.000000e+00> : vector<1xf32>
    %275 = vector.multi_reduction <add>, %274, %cst_74 [1, 2] : vector<1x8x1xf32> to vector<1xf32>
    %276 = vector.shape_cast %275 : vector<1xf32> to vector<1x1x1xf32>
    %277 = vector.extract %276[0, 0, 0] : f32 from vector<1x1x1xf32>
    %278 = vector.broadcast %277 : f32 to vector<1x1xf32>
    %cst_75 = arith.constant 8.000000e+00 : f32
    %279 = vector.broadcast %cst_75 : f32 to vector<1x1xf32>
    %280 = arith.divf %278, %279 : vector<1x1xf32>
    %cst_76 = arith.constant 0.000000e+00 : f32
    %281 = vector.shape_cast %280 : vector<1x1xf32> to vector<1x1xf32>
    %282 = vector.broadcast %281 : vector<1x1xf32> to vector<1x8xf32>
    %283 = vector.broadcast %cst_76 : f32 to vector<1x8xf32>
    %284 = arith.select %273, %282, %283 : vector<1x8xi1>, vector<1x8xf32>
    %285 = arith.addf %271, %284 : vector<1x8xf32>
    %c7_i32 = arith.constant 7 : i32
    %286 = vector.broadcast %c7_i32 : i32 to vector<1x8xi32>
    %287 = arith.cmpi eq, %223, %286 : vector<1x8xi32>
    %cst_77 = arith.constant 0.000000e+00 : f32
    %288 = vector.shape_cast %127 : vector<1x1xf32> to vector<1x1xf32>
    %289 = vector.broadcast %288 : vector<1x1xf32> to vector<1x8xf32>
    %290 = vector.broadcast %cst_77 : f32 to vector<1x8xf32>
    %291 = arith.select %287, %289, %290 : vector<1x8xi1>, vector<1x8xf32>
    %292 = arith.addf %285, %291 : vector<1x8xf32>
    %c0_78 = arith.constant 0 : index
    %c0_79 = arith.constant 0 : index
    %293 = vector.load %arg6[%c0_78, %c0_79] : memref<1x8xf32, #tpu.memory_space<vmem>>, vector<1x8xf32>
    tpu.vector_store %arg6[%c0_78, %c0_79], %292 {strides = array<i32>} : memref<1x8xf32, #tpu.memory_space<vmem>>, vector<1x8xf32>,
    return
  }
}

</mosaic_0001>

<bundles_post_ra>
// kernel: tpu_custom_call.1
= control target key start
LH: loop header
LB: loop body
LE: loop exit
PB: predicated region body
PF: predicated region fallthrough
CT: control target
= control target key end

     0   :  { %vm40_vm0 = vcmask 31744   ;;  %s1148_s0 = inlined_call_operand.vmem [shape: f32[8,4], index: 0, kind: input, shape index: {}]   ;;  %s1149_s1 = inlined_call_operand.vmem [shape: s32[8,1], index: 1, kind: input, shape index: {}]   ;;  %s1150_s2 = inlined_call_operand.vmem [shape: f32[8,1], index: 2, kind: input, shape index: {}]   ;;  %s1151_s3 = inlined_call_operand.vmem [shape: f32[8,32], index: 3, kind: input, shape index: {}]   ;;  %s1152_s4 = inlined_call_operand.<no memory space> [shape: f32[1], index: 4, kind: input, shape index: {}]   ;;  %s1153_s5 = inlined_call_operand.<no memory space> [shape: s32[1], index: 5, kind: input, shape index: {}]   ;;  %s1154_s6 = inlined_call_operand.hbm [shape: f32[1,8], index: 6, kind: output, shape index: {}]  }
   0x1   :  { %v26_v0 = vld [vmem:[%s1148_s0] sm:$0xff] }
   0x2   :  { %13 = vsyncpa [#allocation5], 0  ;;  %v41_v1 = vsel %vm40_vm0, %v26_v0, -inf  ;;  %v29_v2 = vld [vmem:[%s1151_s3] sm:$0xff]  ;;  %vm84_vm1 = vcmask 261120   ;;  %v32_v8 = vlaneseq  ;;  %v918_v17 = vmov 0.0  }
   0x3   :  { %42 = vmax.xlane.f32.xlu0 %v41_v1  ;;  %v83_v3 = vmul.f32 %v29_v2, %v29_v2  ;;  %830 = vmatprep.subr.mxu0 %v918_v17  ;;  %vm919_vm3 = vmmov 0   ;;  %vm96_vm8 = vcmask 64512   ;;  %v920_v48 = vmov 0   ;;  %v27_v58 = vld [vmem:[%s1149_s1] sm:$0xff]  ;;  %p310_p0 = scmp.eq.s32.totalorder %s1153_s5, 0  ;;  %s921_s15 = smov [#allocation4]  }
   0x4   :  { %v968_v9 = vand.u32 127, %v32_v8  ;;  %835 = vmatprep.subr.mxu1 %v918_v17  ;;  %832 = vmatprep.mubr.msk.f32.mxu0 %vm919_vm3, %v918_v17  ;;  %v1021_v33 = vshrl.u32 %v32_v8, 7  ;;  %vm264_vm14 = vcmask 7168   ;;  %s316_s8 = smul.f32 0.9, %s1152_s4  ;;  %s786_s16 = sshll.u32 %s921_s15, 4  ;;  %s787_s16 = int_to_ptr.vmem [resolvable:$true] %s786_s16 }
   0x5   :  { %v85_v4 = vsel %vm84_vm1, %v83_v3, 0.0  ;;  %837 = vmatprep.mubr.msk.f32.mxu1 %vm919_vm3, %v918_v17  ;;  %878 = vset.pattern.permute.xlu0 %v920_v48  ;;  %s311_s28 = scalar_select %p310_p0, 1, 0 }
   0x6   :  { %86 = vadd.xlane.f32.xlu1 %v85_v4  ;;  %vm89_vm6 = vcmp.eq.s32.totalorder %v968_v9, 1  ;;  %vm88_vm7 = vcmp.eq.s32.totalorder %v968_v9, 0  ;;  %v251_v34 = vsub.s32 0, %v1021_v33  ;;  %vm248_vm9 = vcmp.lt.s32.totalorder %v968_v9, %v1021_v33  ;;  %s894_s17 = scalar_lea.vmem %s787_s16, 16  ;;  %s898_s18 = scalar_lea.vmem %s787_s16, 32 }
   0x7   :  { %v796_v31 = vsel %vm88_vm7, 1.0, %v918_v17  ;;  %v797_v32 = vsel %vm89_vm6, 1.0, %v918_v17  ;;  %879 = vset.pattern.permute.xlu1 %v920_v48  ;;  %s312_s29 = scvt.s32.f32 %s311_s28  ;;  %p895_p1 = scmp.ne.s32.totalorder %s787_s16, %s894_s17 }
   0x8   :  { %p899_p2 = scmp.lt.s32.totalorder %s787_s16, %s787_s16  ;;  %p900_p3 = scmp.lt.s32.totalorder %s898_s18, %s894_s17 }
   0x9   :  { %s315_s10 = ssub.f32 1.0, %s312_s29 }
   0xa   :  { %p901_p4 = por %p900_p3, %p899_p2 }
   0xc   :  { %p902_p5 = pnand %p901_p4, %p895_p1 }
  0x90   :  { %v43_v5 = vpop.xlane.xlu0 %42 }
  0x91   :  { %v965_v6 = vsub.f32 %v26_v0, %v43_v5 }
  0x93   :  { %v45_v7 = vmul.f32 1.442695, %v965_v6  ;;  %vm63_vm2 = vcmp.ge.f32.partialorder %v965_v6, 0.0  ;;  %v87_v18 = vpop.xlane.xlu1 %86 }
  0x94   :  { %v64_v10 = vsel %vm63_vm2, %v968_v9, 4  ;;  %vm346_vm4 = vcmp.eq.f32.partialorder %v87_v18, inf  ;;  %v349_v21 = vand.u32 2147483648, %v87_v18  ;;  %vm348_vm5 = vcmp.eq.f32.partialorder %v87_v18, 0.0 }
  0x95   :  { %880 = vpow2.f32 %v45_v7  ;;  %v973_v11 = vsel %vm40_vm0, %v64_v10, 2147483647  ;;  %v90_v27 = vsel %vm89_vm6, %v87_v18, 0.0 }
  0x96   :  { %v67_v14 = vshra.s32 %v973_v11, 16  ;;  %882 = vrsqrt.f32 %v87_v18  ;;  %v66_v51 = vand.u32 65535, %v973_v11 }
  0x98   :  { %v981_v16 = vcvt.s32.f32 %v67_v14  ;;  %v68_v56 = vcvt.s32.f32 %v66_v51 }
  0x9f   :  { %v975_v12 = vpop.eup %880 }
  0xa0   :  { %v57_v13 = vmul.f32 %v975_v12, %v975_v12  ;;  %v883_v19 = vpop.eup %882  ;;  %v47_v59 = vsel %vm40_vm0, %v975_v12, 0.0 }
  0xa1   :  { %v345_v20 = vmul.f32 %v883_v19, %v87_v18 }
  0xa2   :  { %v58_v15 = vsel %vm40_vm0, %v57_v13, 0.0 }
  0xa3   :  { %59 = vadd.xlane.f32.xlu0 %v58_v15  ;;  %v347_v22 = vsel %vm346_vm4, %v87_v18, %v345_v20 }
  0xa4   :  { %v350_v23 = vsel %vm348_vm5, %v349_v21, %v347_v22 }
  0xa5   :  { %v351_v24 = vmax.f32 %v350_v23, 1e-12 }
  0xa7   :  { %70 = vmin.xlane.f32.xlu0 %v981_v16  ;;  %884 = vrcp.f32 %v351_v24 }
  0xb1   :  { %v885_v26 = vpop.eup %884 }
  0xb2   :  { %v994_v28 = vmul.f32 %v885_v26, %v29_v2 }
 0x130   :  { %v60_v25 = vpop.xlane.xlu0 %59 }
 0x131   :  { %886 = vrcp.f32 %v60_v25 }
 0x134   :  { %v71_v50 = vpop.xlane.xlu0 %70 }
 0x135   :  { %v77_v14 = vcvt.f32.s32 %v71_v50 }
 0x137   :  { %v78_v15 = vshll.u32 %v77_v14, 16 }
 0x13b   :  { %v996_v29 = vpop.eup %886 }
 0x13c   :  { %v91_v30 = vsel %vm88_vm7, %v996_v29, %v90_v27 }
 0x13d   :  { %831 = vmatpush3.xpose.msk.msra.mxu0 %vm96_vm8, %v91_v30  ;;  %836 = vmatpush3.xpose.msk.msra.mxu1 %vm96_vm8, %v91_v30 }
 0x13e   :  { %848 = vmatprep.subr.mxu1 %v918_v17  ;;  %840 = vmatprep.subr.mxu0 %v994_v28 }
 0x140   :  { %833 = vmatmul.mubr.msk.f32.vlgmr.msra.gmra.mrb[0].mxu0 %vm96_vm8, %v796_v31  ;;  %838 = vmatmul.mubr.msk.f32.vlgmr.msra.gmra.mrb[0].mxu1 %vm96_vm8, %v797_v32 }
 0x141   :  { %849 = vmatpush3.xpose.msk.msra.mxu1 %vm84_vm1, %v29_v2  ;;  %850 = vmatprep.mubr.msk.f32.mxu1 %vm919_vm3, %v918_v17 }
 0x142   :  { %841 = vmatpush3.msra.mxu0 %v994_v28  ;;  %853 = vmatprep.subr.mxu1 %v918_v17 }
 0x144   :  { %851 = vmatmul.mubr.msk.f32.vlgmr.msra.gmra.mrb[2].mxu1 %vm84_vm1, %v29_v2 }
 0x145   :  { %855 = vmatprep.mubr.msk.f32.mxu1 %vm919_vm3, %v918_v17  ;;  %vm72_vm3 = vcmp.eq.f32.partialorder %v981_v16, %v71_v50  ;;  %v483_v50 = vadd.s32 8, %v1021_v33 }
 0x146   :  { %v73_v57 = vsel %vm72_vm3, %v68_v56, inf }
 0x213   :  { %v169_v35 = vpop.f32.mrb[0].mxu0  ;;  %v242_v36 = vpop.f32.mrb[0].mxu1 }
 0x214   :  { %v252_v37 = vrot.slane %v169_v35, %v251_v34  ;;  %v599_v38 = vrot.slane %v242_v36, %v251_v34  ;;  %v834_v39 = vpop.f32.mrb[1].mxu0  ;;  %v839_v40 = vpop.f32.mrb[1].mxu1 }
 0x216   :  { %vm253_vm10 = vcmp.lt.f32.partialorder %v252_v37, %v996_v29  ;;  %vm254_vm11 = vcmp.eq.f32.partialorder %v252_v37, %v996_v29  ;;  %v1028_v42 = vadd.f32 %v599_v38, %v87_v18 }
 0x217   :  { %v592_v41 = vpop.f32.mrb[2].mxu1  ;;  %vm255_vm12 = vmand %vm254_vm11, %vm248_vm9 }
 0x218   :  { %v1030_v43 = vmul.f32 2.0, %v592_v41  ;;  %vm256_vm13 = vmor %vm253_vm10, %vm255_vm12  ;;  %v852_v44 = vpop.f32.mrb[3].mxu1 }
 0x219   :  { %v802_v45 = vsel %vm256_vm13, 1.0, %v918_v17 }
 0x21a   :  { %v602_v46 = vsub.f32 %v1028_v42, %v1030_v43  ;;  %v259_v47 = vsel %vm96_vm8, %v802_v45, 0.0 }
 0x21b   :  { %260 = vadd.xlane.f32.xlu1 %v259_v47 }
 0x2a8   :  { %v261_v49 = vpop.xlane.xlu1 %260 }
 0x2a9   :  { %vm262_vm15 = vcmp.eq.f32.partialorder %v261_v49, 3.0  ;;  %vm276_vm2 = vcmp.eq.f32.partialorder %v261_v49, 4.0 }
 0x2aa   :  { %v277_v52 = vsel %vm276_vm2, %v996_v29, 0.0  ;;  %v263_v53 = vsel %vm262_vm15, %v996_v29, 0.0  ;;  %vm486_vm15 = vcmp.eq.s32.totalorder %v1021_v33, %v968_v9  ;;  %vm487_vm2 = vcmp.eq.s32.totalorder %v483_v50, %v968_v9 }
 0x2ab   :  { %v278_v54 = vsel %vm264_vm14, %v277_v52, 0.0  ;;  %v265_v55 = vsel %vm264_vm14, %v263_v53, 0.0  ;;  %v809_v56 = vsel %vm486_vm15, 1.0, %v918_v17 }
 0x2ac   :  { %279 = vadd.xlane.f32.xlu0 %v278_v54  ;;  %266 = vadd.xlane.f32.xlu1 %v265_v55  ;;  %v810_v55 = vsel %vm487_vm2, 1.0, %v918_v17 }
 0x2b0   :  { %74 = vmin.xlane.f32.xlu1 %v73_v57  ;;  %v485_v57 = vadd.s32 24, %v1021_v33 }
 0x2c2   :  { %35 = vperm.xlu0 %878, %v27_v58  }
 0x2e1   :  { %48 = vadd.xlane.f32.xlu0 %v47_v59 }
 0x339   :  { %v267_v60 = vpop.xlane.xlu1 %266  ;;  %v280_v61 = vpop.xlane.xlu0 %279 }
 0x33a   :  { %v268_v62 = vrot.slane %v267_v60, 4  ;;  %v281_v63 = vrot.slane %v280_v61, 4 }
 0x33c   :  { %v269_v0 = vadd.f32 %v268_v62, %v267_v60  ;;  %v282_v1 = vadd.f32 %v281_v63, %v280_v61  ;;  %v484_v60 = vadd.s32 16, %v1021_v33 }
 0x33d   :  { %v75_v13 = vpop.xlane.xlu1 %74 }
 0x33e   :  { %v270_v2 = vrot.slane %v269_v0, 2  ;;  %v283_v3 = vrot.slane %v282_v1, 2  ;;  %v76_v12 = vcvt.f32.s32 %v75_v13  ;;  %vm488_vm3 = vcmp.eq.s32.totalorder %v484_v60, %v968_v9 }
 0x33f   :  { %v811_v33 = vsel %vm488_vm3, 1.0, %v918_v17 }
 0x340   :  { %v271_v4 = vadd.f32 %v270_v2, %v269_v0  ;;  %v284_v5 = vadd.f32 %v283_v3, %v282_v1  ;;  %v79_v16 = vadd.s32 %v78_v15, %v76_v12 }
 0x341   :  { %v36_v25 = vpop.permute.xlu0 %35 }
 0x342   :  { %v272_v7 = vrot.slane %v271_v4, 1  ;;  %v285_v8 = vrot.slane %v284_v5, 1  ;;  %vm80_vm4 = vcmp.eq.s32.totalorder %v79_v16, %v27_v58  ;;  %vm37_vm11 = vcmp.eq.s32.totalorder %v968_v9, %v36_v25 }
 0x343   :  { %v795_v22 = vsel %vm80_vm4, 1.0, %v918_v17  ;;  %v794_v26 = vsel %vm37_vm11, 1.0, %v918_v17  ;;  %vm713_vm4 = vcmask 24576   ;;  %vm756_vm11 = vcmp.eq.s32.totalorder %v968_v9, 5 }
 0x344   :  { %v273_v10 = vadd.f32 %v272_v7, %v271_v4  ;;  %v286_v11 = vadd.f32 %v285_v8, %v284_v5  ;;  %vm293_vm9 = vcmp.eq.f32.partialorder %v795_v22, 1.0  ;;  %v52_v27 = vmul.f32 %v794_v26, %v965_v6 }
 0x346   :  { %858 = vpush %v273_v10  ;;  %v53_v30 = vsel %vm40_vm0, %v52_v27, 0.0 }
 0x347   :  { %860 = vpush %v286_v11 }
 0x36e   :  { %v49_v42 = vpop.xlane.xlu0 %48 }
 0x377   :  { %s859_s1 = spop %858 }
 0x378   :  { %v275_v18 = vstv %s859_s1  ;;  %s861_s25 = spop %860 }
 0x379   :  { %v288_v19 = vstv %s861_s25 }
 0x37a   :  { %v289_v20 = vsub.f32 %v288_v19, %v275_v18 }
 0x37c   :  { %v290_v21 = vmul.f32 0.5, %v289_v20 }
 0x37e   :  { %v291_v23 = vadd.f32 %v290_v21, %v275_v18 }
 0x380   :  { %vm292_vm5 = vcmp.gt.f32.partialorder %v996_v29, %v291_v23  ;;  %v603_v29 = vmax.f32 %v602_v46, 0.0 }
 0x381   :  { %vm294_vm10 = vmand %vm292_vm5, %vm293_vm9  ;;  %vm747_vm5 = vcmp.eq.s32.totalorder %v968_v9, 2  ;;  %vm750_vm9 = vcmp.eq.s32.totalorder %v968_v9, 3 }
 0x382   :  { %v1050_v24 = vsel %vm294_vm10, 1.0, %v918_v17  ;;  %888 = vrsqrt.f32 %v603_v29  ;;  %vm606_vm12 = vcmp.eq.f32.partialorder %v603_v29, inf  ;;  %vm608_vm13 = vcmp.eq.f32.partialorder %v603_v29, 0.0 }
 0x383   :  { %614 = vperm.xlu1 %879, %v1050_v24   ;;  %890 = vlog2.f32 %v49_v42  ;;  %vm753_vm10 = vcmp.eq.s32.totalorder %v968_v9, 4 }
 0x38c   :  { %v889_v31 = vpop.eup %888 }
 0x38d   :  { %v605_v32 = vmul.f32 %v889_v31, %v603_v29  ;;  %v891_v43 = vpop.eup %890 }
 0x38e   :  { %v51_v44 = vmul.f32 0.6931472, %v891_v43 }
 0x38f   :  { %v607_v34 = vsel %vm606_vm12, %v603_v29, %v605_v32  ;;  %vm778_vm12 = vcmask 57344  }
 0x3ac   :  { %354 = vxpose.xlu1.b32.start.end [1/1] (short) (narrow) %v994_v28, 32  ;;  %v609_v28 = vand.u32 2147483648, %v603_v29 }
 0x3ae   :  { %v610_v36 = vsel %vm608_vm13, %v609_v28, %v607_v34 }
 0x3af   :  { %v611_v37 = vsel %vm486_vm15, 0.0, %v610_v36 }
 0x3df   :  { %54 = vadd.xlane.f32.xlu1 %v53_v30 }
 0x402   :  { %v615_v35 = vpop.permute.xlu1 %614 }
 0x403   :  { %v1063_v6 = vmul.f32 %v794_v26, %v615_v35 }
 0x405   :  { %854 = vmatpush3.msra.mxu1 %v1063_v6  ;;  %v691_v21 = vsel %vm40_vm0, %v1063_v6, 0.0 }
 0x406   :  { %856 = vmatmul.mubr.msk.f32.vlgmr.msra.gmra.mrb[4].mxu1 %vm96_vm8, %v611_v37  ;;  %v692_v22 = vrot.slane %v691_v21, 4 }
 0x408   :  { %v693_v23 = vadd.f32 %v692_v22, %v691_v21 }
 0x40a   :  { %v694_v25 = vrot.slane %v693_v23, 2 }
 0x40c   :  { %v695_v26 = vadd.f32 %v694_v25, %v693_v23 }
 0x40e   :  { %v696_v30 = vrot.slane %v695_v26, 1 }
 0x410   :  { %v697_v31 = vadd.f32 %v696_v30, %v695_v26 }
 0x412   :  { %v816_v34 = vadd.f32 -1.0, %v697_v31 }
 0x414   :  { %v707_v37 = vmul.f32 %v816_v34, %v697_v31 }
 0x42c   :  { %v370_v38 = vpop.trf.xlu1 }
 0x42d   :  { %842 = vmatprep.mubr.msk.f32.mxu0 %vm96_vm8, %v370_v38 }
 0x430   :  { %v371_v39 = vpop.trf.xlu1 }
 0x431   :  { %843 = vmatmul.mubr.msk.f32.vlgmr.msra.gmra.mrb[2].mxu0 %vm96_vm8, %v371_v39 }
 0x434   :  { %v372_v40 = vpop.trf.xlu1 }
 0x435   :  { %845 = vmatprep.mubr.msk.f32.mxu0 %vm96_vm8, %v372_v40  ;;  %v313_v40 = vstv %s312_s29 }
 0x438   :  { %v373_v41 = vpop.trf.xlu1 }
 0x439   :  { %846 = vmatmul.mubr.msk.f32.gmra.mrb[4].mxu0 %vm96_vm8, %v373_v41  ;;  %vm489_vm8 = vcmp.eq.s32.totalorder %v485_v57, %v968_v9  ;;  %v320_v41 = vstv %s315_s10 }
 0x43a   :  { %v812_v7 = vsel %vm489_vm8, 1.0, %v918_v17 }
 0x46c   :  { %v55_v45 = vpop.xlane.xlu1 %54 }
 0x46d   :  { %v1074_v46 = vsub.f32 %v51_v44, %v55_v45 }
 0x46f   :  { %v297_v47 = vsel %vm264_vm14, %v1074_v46, 0.0 }
 0x470   :  { %298 = vadd.xlane.f32.xlu0 %v297_v47 }
 0x4d9   :  { %v687_v48 = vpop.f32.mrb[4].mxu1 }
 0x4da   :  { %v857_v49 = vpop.f32.mrb[5].mxu1  ;;  %v698_v27 = vmul.f32 %v687_v48, %v1063_v6  ;;  %v318_v6 = vstv %s316_s8 }
 0x4dc   :  { %v699_v29 = vsel %vm40_vm0, %v698_v27, 0.0  ;;  %vm708_vm0 = vcmp.ge.f32.partialorder %v697_v31, 2.0 }
 0x4dd   :  { %v700_v32 = vrot.slane %v699_v29, 4  ;;  %v709_v43 = vsel %vm708_vm0, %v707_v37, 1.0 }
 0x4de   :  { %892 = vrcp.f32 %v709_v43 }
 0x4df   :  { %v701_v28 = vadd.f32 %v700_v32, %v699_v29 }
 0x4e1   :  { %v702_v39 = vrot.slane %v701_v28, 2 }
 0x4e3   :  { %v703_v47 = vadd.f32 %v702_v39, %v701_v28 }
 0x4e5   :  { %v704_v50 = vrot.slane %v703_v47, 1 }
 0x4e8   :  { %v893_v57 = vpop.eup %892 }
 0x4fd   :  { %v299_v51 = vpop.xlane.xlu0 %298 }
 0x4fe   :  { %v300_v52 = vrot.slane %v299_v51, 4 }
 0x500   :  { %v301_v53 = vadd.f32 %v300_v52, %v299_v51  ;;  %v28_v51 = vld [vmem:[%s1150_s2] sm:$0xff] }
 0x502   :  { %v302_v54 = vrot.slane %v301_v53, 2 }
 0x504   :  { %v303_v58 = vadd.f32 %v302_v54, %v301_v53  ;;  %v844_v59 = vpop.f32.mrb[2].mxu0  ;;  %v705_v54 = vadd.f32 %v704_v50, %v703_v47 }
 0x505   :  { %v499_v61 = vsub.f32 %v844_v59, %v810_v55  ;;  %v464_v62 = vpop.f32.mrb[3].mxu0 }
 0x506   :  { %v304_v63 = vrot.slane %v303_v58, 1  ;;  %v498_v0 = vsub.f32 %v464_v62, %v809_v56  ;;  %v711_v59 = vmul.f32 %v893_v57, %v705_v54 }
 0x507   :  { %v503_v1 = vmul.f32 %v499_v61, %v499_v61 }
 0x508   :  { %v305_v2 = vadd.f32 %v304_v63, %v303_v58  ;;  %v502_v3 = vmul.f32 %v498_v0, %v498_v0  ;;  %v712_v62 = vsel %vm708_vm0, %v711_v59, 0.0 }
 0x509   :  { %v507_v4 = vsel %vm84_vm1, %v503_v1, 0.0  ;;  %v714_v63 = vsel %vm713_vm4, %v712_v62, 0.0 }
 0x50a   :  { %862 = vpush %v305_v2  ;;  %v506_v5 = vsel %vm84_vm1, %v502_v3, 0.0 }
 0x50b   :  { %v508_v8 = vadd.f32 %v507_v4, %v506_v5 }
 0x50c   :  { %v847_v10 = vpop.f32.mrb[4].mxu0 }
 0x50d   :  { %v501_v11 = vsub.f32 %v847_v10, %v812_v7  ;;  %v474_v13 = vpop.f32.mrb[5].mxu0 }
 0x50e   :  { %v500_v14 = vsub.f32 %v474_v13, %v811_v33 }
 0x50f   :  { %v505_v12 = vmul.f32 %v501_v11, %v501_v11 }
 0x510   :  { %v504_v15 = vmul.f32 %v500_v14, %v500_v14 }
 0x511   :  { %v511_v18 = vsel %vm84_vm1, %v505_v12, 0.0 }
 0x512   :  { %v509_v16 = vsel %vm84_vm1, %v504_v15, 0.0 }
 0x513   :  { %v510_v19 = vadd.f32 %v509_v16, %v508_v8 }
 0x515   :  { %v512_v20 = vadd.f32 %v511_v18, %v510_v19 }
 0x517   :  { %513 = vadd.xlane.f32.xlu0 %v512_v20 }
 0x53b   :  { %s863_s9 = spop %862 }
 0x53c   :  { %v307_v35 = vstv %s863_s9 }
 0x53d   :  { %v1105_v36 = vmul.f32 0.125, %v307_v35 }
 0x53f   :  { %v317_v38 = vmul.f32 0.1, %v1105_v36  ;;  %v314_v44 = vmul.f32 %v313_v40, %v1105_v36 }
 0x541   :  { %v319_v42 = vadd.f32 %v318_v6, %v317_v38 }
 0x543   :  { %v321_v45 = vmul.f32 %v320_v41, %v319_v42 }
 0x545   :  { %v1110_v48 = vadd.f32 %v321_v45, %v314_v44 }
 0x547   :  { %v323_v49 = vmul.f32 1.5, %v1110_v48 }
 0x549   :  { %vm324_vm1 = vcmp.lt.f32.partialorder %v1074_v46, %v323_v49 }
 0x54a   :  { %v804_v52 = vsel %vm324_vm1, 1.0, %v918_v17  ;;  %v727_v17 = vsel %vm264_vm14, %v1050_v24, 0.0 }
 0x54b   :  { %v328_v53 = vsub.f32 1.0, %v804_v52  ;;  %v327_v55 = vmul.f32 %v804_v52, %v28_v51  ;;  %v745_v51 = vsel %vm89_vm6, %v1105_v36, 0.0  ;;  %vm760_vm6 = vcmp.eq.s32.totalorder %v968_v9, 6 }
 0x54d   :  { %v329_v56 = vmul.f32 0.1, %v328_v53 }
 0x54f   :  { %v330_v58 = vadd.f32 %v329_v56, %v327_v55 }
 0x551   :  { %v331_v60 = vmul.f32 %v330_v58, %v1074_v46  ;;  %v761_v0 = vsel %vm264_vm14, %v330_v58, 0.0 }
 0x553   :  { %v332_v61 = vsel %vm264_vm14, %v331_v60, 0.0 }
 0x554   :  { %333 = vadd.xlane.f32.xlu0 %v332_v61 }
 0x558   :  { %715 = vadd.xlane.f32.xlu0 %v714_v63 }
 0x55c   :  { %728 = vadd.xlane.f32.xlu0 %v727_v17 }
 0x560   :  { %762 = vadd.xlane.f32.xlu0 %v761_v0 }
 0x5a4   :  { %v514_v1 = vpop.xlane.xlu0 %513 }
 0x5a5   :  { %v515_v2 = vrot.slane %v514_v1, 4 }
 0x5a7   :  { %v516_v3 = vadd.f32 %v515_v2, %v514_v1 }
 0x5a9   :  { %v517_v4 = vrot.slane %v516_v3, 2 }
 0x5ab   :  { %v518_v33 = vadd.f32 %v517_v4, %v516_v3 }
 0x5ad   :  { %v519_v15 = vrot.slane %v518_v33, 1 }
 0x5af   :  { %v520_v23 = vadd.f32 %v519_v15, %v518_v33 }
 0x5e1   :  { %v334_v46 = vpop.xlane.xlu0 %333 }
 0x5e2   :  { %v335_v5 = vrot.slane %v334_v46, 4 }
 0x5e4   :  { %v336_v7 = vadd.f32 %v335_v5, %v334_v46 }
 0x5e5   :  { %v716_v8 = vpop.xlane.xlu0 %715 }
 0x5e6   :  { %v337_v10 = vrot.slane %v336_v7, 2  ;;  %v717_v11 = vrot.slane %v716_v8, 4 }
 0x5e8   :  { %v718_v13 = vadd.f32 %v717_v11, %v716_v8  ;;  %v338_v14 = vadd.f32 %v337_v10, %v336_v7 }
 0x5e9   :  { %v729_v12 = vpop.xlane.xlu0 %728 }
 0x5ea   :  { %v719_v24 = vrot.slane %v718_v13, 2  ;;  %v730_v16 = vrot.slane %v729_v12, 4  ;;  %v339_v18 = vrot.slane %v338_v14, 1 }
 0x5ec   :  { %v731_v19 = vadd.f32 %v730_v16, %v729_v12  ;;  %v340_v20 = vadd.f32 %v339_v18, %v338_v14  ;;  %v720_v21 = vadd.f32 %v719_v24, %v718_v13 }
 0x5ed   :  { %v763_v22 = vpop.xlane.xlu0 %762 }
 0x5ee   :  { %v732_v25 = vrot.slane %v731_v19, 2  ;;  %v764_v26 = vrot.slane %v763_v22, 4  ;;  %864 = vpush %v340_v20  ;;  %v721_v27 = vrot.slane %v720_v21, 1 }
 0x5ef   :  { %866 = vpush %v520_v23 }
 0x5f0   :  { %v765_v30 = vadd.f32 %v764_v26, %v763_v22  ;;  %v722_v29 = vadd.f32 %v721_v27, %v720_v21  ;;  %v733_v31 = vadd.f32 %v732_v25, %v731_v19 }
 0x5f2   :  { %v766_v32 = vrot.slane %v765_v30, 2  ;;  %868 = vpush %v722_v29  ;;  %v734_v34 = vrot.slane %v733_v31, 1 }
 0x5f4   :  { %v767_v28 = vadd.f32 %v766_v32, %v765_v30  ;;  %v735_v35 = vadd.f32 %v734_v34, %v733_v31 }
 0x5f6   :  { %870 = vpush %v735_v35  ;;  %v768_v6 = vrot.slane %v767_v28, 1 }
 0x5f8   :  { %v769_v37 = vadd.f32 %v768_v6, %v767_v28 }
 0x5fa   :  { %872 = vpush %v769_v37 }
 0x61f   :  { %s865_s2 = spop %864 }
 0x620   :  { %s867_s11 = spop %866  ;;  %v342_v39 = vstv %s865_s2 }
 0x621   :  { %v522_v42 = vstv %s867_s11  ;;  %v343_v44 = vmul.f32 0.125, %v342_v39 }
 0x622   :  { %v742_v47 = vmul.f32 0.005, %v522_v42  ;;  %v754_v60 = vsel %vm753_vm10, %v522_v42, 0.0 }
 0x623   :  { %s869_s12 = spop %868  ;;  %v748_v54 = vsel %vm747_vm5, %v343_v44, 0.0 }
 0x624   :  { %v724_v38 = vstv %s869_s12 }
 0x625   :  { %v726_v40 = vmul.f32 0.25, %v724_v38 }
 0x627   :  { %s871_s13 = spop %870 }
 0x628   :  { %v737_v41 = vstv %s871_s13 }
 0x629   :  { %vm738_vm14 = vcmp.ge.f32.partialorder %v737_v41, 2.0  ;;  %v757_v58 = vmul.f32 0.125, %v737_v41 }
 0x62a   :  { %v739_v43 = vsel %vm738_vm14, %v726_v40, 0.0 }
 0x62b   :  { %v740_v45 = vmul.f32 0.05, %v739_v43  ;;  %s873_s14 = spop %872  ;;  %v751_v57 = vsel %vm750_vm9, %v739_v43, 0.0  ;;  %v758_v62 = vsel %vm756_vm11, %v757_v58, 0.0 }
 0x62c   :  { %v771_v56 = vstv %s873_s14 }
 0x62d   :  { %v741_v49 = vadd.f32 %v740_v45, %v343_v44  ;;  %v772_v61 = vmul.f32 0.125, %v771_v56 }
 0x62f   :  { %v743_v50 = vadd.f32 %v742_v47, %v741_v49  ;;  %v773_v17 = vsel %vm760_vm6, %v772_v61, 0.0 }
 0x631   :  { %v744_v52 = vsel %vm88_vm7, %v743_v50, 0.0  ;;  %vm775_vm7 = vcmp.eq.s32.totalorder %v968_v9, 7 }
 0x632   :  { %v746_v53 = vadd.f32 %v745_v51, %v744_v52  ;;  %v776_v1 = vsel %vm775_vm7, %v1110_v48, 0.0 }
 0x634   :  { %v749_v55 = vadd.f32 %v748_v54, %v746_v53 }
 0x636   :  { %v752_v59 = vadd.f32 %v751_v57, %v749_v55 }
 0x638   :  { %v755_v36 = vadd.f32 %v754_v60, %v752_v59 }
 0x63a   :  { %v759_v63 = vadd.f32 %v758_v62, %v755_v36 }
 0x63c   :  { %v774_v0 = vadd.f32 %v773_v17, %v759_v63 }
 0x63e   :  { %v777_v2 = vadd.f32 %v776_v1, %v774_v0 }
 0x640   :  { %779 = vst.msk [vmem:[#allocation4] sm:$0x1] %vm778_vm12, %v777_v2 }
 0x641   :  { %905 = shalt.err (!%p902_p5)
}
 0x642   :  { %s906_s21 = scalar_lea.hbm %s1154_s6, 16 }
 0x643   :  { %p907_p6 = scmp.ne.s32.totalorder %s1154_s6, %s906_s21  ;;  %p910_p7 = scmp.lt.u32.totalorder %s906_s21, %s1154_s6 }
 0x645   :  { %p912_p8 = pnand %p910_p7, %p907_p6 }
 0x647   :  { %915 = shalt.err (!%p912_p8)
}
 0x648   :  { %789 = dma.vmem_to_hbm [thread:$0]  %s787_s16, 16, %s1154_s6, [#allocation5]  }
 0x649   :  { %916 = dma.done.wait [#allocation5], 16  }
 0x64a   :  { %917 = vsyncadd [#allocation5], 4294967280 }
 0x64b   :  { %793 = vsyncpa [#allocation5], 1 }

</bundles_post_ra>
